<compile_context>
chip_gen: v7x
topology: tpu7x:2x2x1
jax: 0.10.0
libtpu: 0.0.40
codegen_flags: <defaults>
</compile_context>

<pallas_src>
import jax
import jax.numpy as jnp
from jax.experimental import pallas as pl
from jax.experimental.pallas import tpu as pltpu

LANE = 128
SUBLANE = 8
MAX_LANE_W = 8 * LANE                    # up to 1024-wide lane-dense slab
TARGET_BLOCK_BYTES = 4 * 1024 * 1024     # ~4 MiB tiles; x4 double-buffers ~= 16 MiB VMEM
VMEM_LIMIT_BYTES = 32 * 1024 * 1024      # explicit scoped limit, valid on v5e/v6e/v7x


def _round_up(x: int, m: int) -> int:
    return (x + m - 1) // m * m


def _round_down_min(x: int, m: int) -> int:
    return max(m, x // m * m)


def _sublane_multiple(dtype) -> int:
    # Sub-32-bit dtypes pack along sublanes: 8 rows for 32-bit, 16 for 16-bit, 32 for 8-bit.
    bits = jnp.dtype(dtype).itemsize * 8
    return max(SUBLANE, SUBLANE * 32 // bits)


def sinlu_kernel(a_ref, b_ref, x_ref, o_ref):
    # a_ref / b_ref: shape-(1,) f32 scalars in SMEM (kept f32 regardless of x dtype).
    a = a_ref[0]
    b = b_ref[0]
    # Compute in f32 (exact for f32; explicit upcast for low-precision inputs; safe on
    # v5e which has no bf16 VALU/EUP).
    x = x_ref[...].astype(jnp.float32)
    # Exact sigmoid via the tanh identity: one EUP push (tanh) instead of exp + recip,
    # and bit-accurate vs. jax.nn.sigmoid to ~1e-7.
    sig = 0.5 * jnp.tanh(0.5 * x) + 0.5
    o_ref[...] = (sig * (x + a * jnp.sin(b * x))).astype(o_ref.dtype)


def _layout(n: int, itemsize: int, dtype):
    """Pick (lane_w, rows, block_rows) for a flat array of n elements."""
    sub = _sublane_multiple(dtype)
    # Lane width: as wide as possible (up to MAX_LANE_W) without over-padding tiny inputs.
    lane_w = LANE
    while lane_w < MAX_LANE_W and n >= 2 * sub * lane_w:
        lane_w *= 2
    rows = pl.cdiv(n, lane_w)

    # Block rows: target ~TARGET_BLOCK_BYTES per tile, dtype-aware sublane multiple.
    cap = _round_down_min(TARGET_BLOCK_BYTES // (lane_w * itemsize), sub)
    if rows <= cap:
        # One block covering the whole array (block dim == full array dim is allowed).
        block_rows = rows
    else:
        block_rows = cap
        steps = pl.cdiv(rows, block_rows)
        # The single "parallel" grid axis is sharded across v7x's 2 TensorCores; a small
        # odd step count leaves one core partially idle -> nudge to an even split.
        if steps % 2 == 1 and steps <= 15:
            block_rows = max(sub, _round_up(pl.cdiv(rows, steps + 1), sub))
    return lane_w, rows, block_rows


def sinlu(x: jax.Array, a: jax.Array, b: jax.Array) -> jax.Array:
    """Apply SinLU elementwise. x: any shape; a, b: shape (1,) parameters."""
    orig_shape = x.shape
    orig_dtype = x.dtype
    n = x.size
    itemsize = jnp.dtype(orig_dtype).itemsize

    lane_w, rows, block_rows = _layout(n, itemsize, orig_dtype)
    n_padded = rows * lane_w

    flat = x.reshape(-1)
    if n_padded != n:
        # Non-lane-aligned sizes pay one extra HBM read+write here (and a matching slice
        # below). Padding is only to the next lane_w boundary (< lane_w elements), never
        # a full tile; SinLU(0) == 0 so zero padding is semantically safe.
        flat = jnp.pad(flat, (0, n_padded - n))
    x2d = flat.reshape(rows, lane_w)

    grid = (pl.cdiv(rows, block_rows),)   # ragged final block handled by Pallas masking
    block = (block_rows, lane_w)

    # Rough per-element cost hint so XLA schedules neighboring ops sensibly.
    cost = pl.CostEstimate(
        flops=8 * n_padded,
        transcendentals=2 * n_padded,
        bytes_accessed=2 * n_padded * itemsize,
    )

    out2d = pl.pallas_call(
        sinlu_kernel,
        out_shape=jax.ShapeDtypeStruct((rows, lane_w), orig_dtype),
        grid=grid,
        in_specs=[
            pl.BlockSpec(memory_space=pltpu.SMEM),   # a (f32 scalar)
            pl.BlockSpec(memory_space=pltpu.SMEM),   # b (f32 scalar)
            pl.BlockSpec(block, lambda i: (i, 0)),   # x tile
        ],
        out_specs=pl.BlockSpec(block, lambda i: (i, 0)),
        compiler_params=pltpu.CompilerParams(
            dimension_semantics=("parallel",),       # shards grid across v7x's 2 TCs
            vmem_limit_bytes=VMEM_LIMIT_BYTES,       # room for 4 x ~4 MiB buffers on all gens
        ),
        cost_estimate=cost,
    )(a.astype(jnp.float32), b.astype(jnp.float32), x2d)

    out_flat = out2d.reshape(-1)
    if n_padded != n:
        out_flat = out_flat[:n]
    return out_flat.reshape(orig_shape)


def sinlu_ref(x, a, b):
    return jax.nn.sigmoid(x) * (x + a[0] * jnp.sin(b[0] * x))


if __name__ == "__main__":
    key = jax.random.PRNGKey(0)
    # Parameters initialized as in SinLU.__init__ (a=1, b=1), shape (1,)
    a = jnp.ones((1,), dtype=jnp.float32) * 1.0
    b = jnp.ones((1,), dtype=jnp.float32) * 1.0

    # Example input consistent with typical conv feature maps: NCHW (2, 4, 16, 16)
    x = jax.random.normal(key, (2, 4, 16, 16), dtype=jnp.float32)

    out = jax.block_until_ready(sinlu(x, a, b))
    ref = sinlu_ref(x, a, b)

    assert out.shape == x.shape and out.dtype == x.dtype
    # Exact sigmoid now (tanh identity), so tight tolerance.
    assert jnp.allclose(out, ref, atol=1e-5, rtol=1e-5), float(jnp.max(jnp.abs(out - ref)))

    print("KERNEL_OK")
</pallas_src>

<mosaic_0001>
module attributes {stable_mosaic.version = 11 : i64} {
  func.func @sinlu_kernel(%arg0: i32, %arg1: memref<1xf32, #tpu.memory_space<smem>>, %arg2: memref<1xf32, #tpu.memory_space<smem>>, %arg3: memref<8x256xf32, #tpu.memory_space<vmem>>, %arg4: memref<8x256xf32, #tpu.memory_space<vmem>>) attributes {dimension_semantics = [#tpu.dimension_semantics<parallel>], iteration_bounds = array<i64: 1>, scalar_prefetch = 0 : i64, scratch_operands = 0 : i64, tpu.core_type = #tpu.core_type<tc>, window_params = [{transform_indices = @transform_0, window_bounds = array<i64: 1>}, {transform_indices = @transform_1, window_bounds = array<i64: 1>}, {transform_indices = @transform_2, window_bounds = array<i64: 8, 256>}, {transform_indices = @transform_3, window_bounds = array<i64: 8, 256>}]} {
    %c0 = arith.constant 0 : index
    %0 = memref.load %arg1[%c0] : memref<1xf32, #tpu.memory_space<smem>>
    %c0_0 = arith.constant 0 : index
    %1 = memref.load %arg2[%c0_0] : memref<1xf32, #tpu.memory_space<smem>>
    %c0_1 = arith.constant 0 : index
    %c0_2 = arith.constant 0 : index
    %2 = vector.load %arg3[%c0_1, %c0_2] : memref<8x256xf32, #tpu.memory_space<vmem>>, vector<8x256xf32>
    %cst = arith.constant 5.000000e-01 : f32
    %3 = vector.broadcast %cst : f32 to vector<8x256xf32>
    %4 = arith.mulf %3, %2 : vector<8x256xf32>
    %5 = math.tanh %4 : vector<8x256xf32>
    %cst_3 = arith.constant 5.000000e-01 : f32
    %6 = vector.broadcast %cst_3 : f32 to vector<8x256xf32>
    %7 = arith.mulf %6, %5 : vector<8x256xf32>
    %cst_4 = arith.constant 5.000000e-01 : f32
    %8 = vector.broadcast %cst_4 : f32 to vector<8x256xf32>
    %9 = arith.addf %7, %8 : vector<8x256xf32>
    %10 = vector.broadcast %1 : f32 to vector<8x256xf32>
    %11 = arith.mulf %10, %2 : vector<8x256xf32>
    %12 = math.sin %11 : vector<8x256xf32>
    %13 = vector.broadcast %0 : f32 to vector<8x256xf32>
    %14 = arith.mulf %13, %12 : vector<8x256xf32>
    %15 = arith.addf %2, %14 : vector<8x256xf32>
    %16 = arith.mulf %9, %15 : vector<8x256xf32>
    %c0_5 = arith.constant 0 : index
    %c0_6 = arith.constant 0 : index
    %17 = vector.load %arg4[%c0_5, %c0_6] : memref<8x256xf32, #tpu.memory_space<vmem>>, vector<8x256xf32>
    tpu.vector_store %arg4[%c0_5, %c0_6], %16 {strides = array<i32>} : memref<8x256xf32, #tpu.memory_space<vmem>>, vector<8x256xf32>,
    return
  }
  func.func @transform_0(%arg0: i32) -> i32 {
    %c0_i32 = arith.constant 0 : i32
    %c0_i32_0 = arith.constant 0 : i32
    return %c0_i32 : i32
  }
  func.func @transform_1(%arg0: i32) -> i32 {
    %c0_i32 = arith.constant 0 : i32
    %c0_i32_0 = arith.constant 0 : i32
    return %c0_i32 : i32
  }
  func.func @transform_2(%arg0: i32) -> (i32, i32) {
    %c0_i32 = arith.constant 0 : i32
    %c0_i32_0 = arith.constant 0 : i32
    return %arg0, %c0_i32 : i32, i32
  }
  func.func @transform_3(%arg0: i32) -> (i32, i32) {
    %c0_i32 = arith.constant 0 : i32
    %c0_i32_0 = arith.constant 0 : i32
    return %arg0, %c0_i32 : i32, i32
  }
}

</mosaic_0001>

<bundles_post_ra>
// kernel: tpu_custom_call.1
= control target key start
LH: loop header
LB: loop body
LE: loop exit
PB: predicated region body
PF: predicated region fallthrough
CT: control target
= control target key end

     0   :  { %10 = vsyncpa [#allocation5], 0  ;;  %s490_s0 = inlined_call_operand.<no memory space> [shape: f32[1], index: 0, kind: input, shape index: {}]   ;;  %s491_s1 = inlined_call_operand.<no memory space> [shape: f32[1], index: 1, kind: input, shape index: {}]   ;;  %s492_s2 = inlined_call_operand.hbm [shape: f32[8,256], index: 2, kind: input, shape index: {}]   ;;  %s493_s3 = inlined_call_operand.hbm [shape: f32[8,256], index: 3, kind: output, shape index: {}]  }
   0x1   :  { %11 = vsyncpa [#allocation6], 0  ;;  %s360_s12 = smov [#allocation4]   ;;  %s312_s16 = scalar_lea.hbm %s492_s2, 256 }
   0x2   :  { %s22_s13 = sshll.u32 %s360_s12, 4  ;;  %p313_p0 = scmp.ne.s32.totalorder %s492_s2, %s312_s16  ;;  %s23_s13 = int_to_ptr.vmem [resolvable:$true] %s22_s13 }
   0x3   :  { %p316_p1 = scmp.lt.u32.totalorder %s312_s16, %s492_s2 }
   0x5   :  { %p318_p2 = pnand %p316_p1, %p313_p0 }
   0x7   :  { %321 = shalt.err (!%p318_p2)
}
   0x8   :  { %s322_s21 = scalar_lea.vmem %s23_s13, 256  ;;  %p327_p4 = scmp.lt.s32.totalorder %s23_s13, %s23_s13 }
   0x9   :  { %p323_p3 = scmp.ne.s32.totalorder %s23_s13, %s322_s21  ;;  %p328_p5 = scmp.lt.s32.totalorder %s322_s21, %s322_s21 }
   0xb   :  { %p329_p6 = por %p328_p5, %p327_p4 }
   0xd   :  { %p330_p7 = pnand %p329_p6, %p323_p3 }
   0xf   :  { %333 = shalt.err (!%p330_p7)
}
  0x10   :  { %25 = dma.hbm_to_vmem [thread:$0]  %s492_s2, 256, %s23_s13, [#allocation5]  }
  0x11   :  { %356 = dma.done.wait [#allocation5], 256  }
  0x12   :  { %357 = vsyncadd [#allocation5], 4294967040  ;;  %v41_v0 = vstv %s491_s1  ;;  %v403_v1 = vld [vmem:[#allocation4] sm:$0xff]  ;;  %v405_v2 = vld [vmem:[#allocation4 + $0x8] sm:$0xff]  ;;  %v361_v22 = vmov 683565275  }
  0x13   :  { %v408_v3 = vmul.f32 %v41_v0, %v403_v1  ;;  %v411_v4 = vmul.f32 %v41_v0, %v405_v2  ;;  %v362_v24 = vmov 2475754826   ;;  %v363_v26 = vmov 2131351028  }
  0x14   :  { %v364_v28 = vmov 2102212464   ;;  %v365_v30 = vmov 920167782   ;;  %v366_v39 = vmov 1326507024  }
  0x15   :  { %v47_v5 = vand.u32 2139095040, %v408_v3  ;;  %v44_v6 = vand.u32 2147483647, %v408_v3  ;;  %v151_v8 = vand.u32 2139095040, %v411_v4  ;;  %v148_v12 = vand.u32 2147483647, %v411_v4 }
  0x16   :  { %vm46_vm14 = vcmp.lt.s32.totalorder %v408_v3, 0 }
  0x17   :  { %v48_v7 = vshrl.u32 %v47_v5, 23  ;;  %v152_v10 = vshrl.u32 %v151_v8, 23  ;;  %v51_v11 = vand.u32 8388607, %v44_v6  ;;  %v155_v18 = vand.u32 8388607, %v148_v12 }
  0x18   :  { %vm45_vm15 = vcmp.le.f32.partialorder %v44_v6, 0.7853982 }
  0x19   :  { %v276_v9 = vadd.s32 4294967169, %v48_v7  ;;  %v280_v14 = vadd.s32 4294967169, %v152_v10  ;;  %v52_v16 = vor.u32 8388608, %v51_v11  ;;  %v156_v33 = vor.u32 8388608, %v155_v18 }
  0x1b   :  { %v54_v13 = vadd.s32 1, %v276_v9  ;;  %v158_v15 = vadd.s32 1, %v280_v14  ;;  %v421_v32 = vshll.u32 %v52_v16, 8  ;;  %v196_v61 = vshll.u32 %v156_v33, 8 }
  0x1d   :  { %vm55_vm0 = vcmp.gt.s32.totalorder %v54_v13, 0  ;;  %vm159_vm1 = vcmp.gt.s32.totalorder %v158_v15, 0 }
  0x1e   :  { %v56_v17 = vsel %vm55_vm0, %v54_v13, 0  ;;  %v160_v41 = vsel %vm159_vm1, %v158_v15, 0  ;;  %vm150_vm0 = vcmp.lt.s32.totalorder %v411_v4, 0  ;;  %vm462_vm1 = vcmp.le.f32.partialorder %v148_v12, 0.7853982 }
  0x1f   :  { %v58_v19 = vand.u32 31, %v56_v17  ;;  %v57_v20 = vshrl.u32 %v56_v17, 5  ;;  %v161_v56 = vshrl.u32 %v160_v41, 5  ;;  %v162_v57 = vand.u32 31, %v160_v41 }
  0x21   :  { %v59_v21 = vsub.s32 32, %v58_v19  ;;  %v61_v23 = vshll.u32 %v361_v22, %v58_v19  ;;  %v64_v25 = vshll.u32 %v362_v24, %v58_v19  ;;  %v67_v27 = vshll.u32 %v363_v26, %v58_v19 }
  0x22   :  { %v70_v29 = vshll.u32 %v364_v28, %v58_v19  ;;  %v73_v31 = vshll.u32 %v365_v30, %v58_v19  ;;  %vm76_vm2 = vcmp.lt.s32.totalorder %v57_v20, 1  ;;  %vm79_vm3 = vcmp.lt.s32.totalorder %v57_v20, 4 }
  0x23   :  { %v60_v34 = vshrl.u32 %v361_v22, %v59_v21  ;;  %v62_v35 = vshrl.u32 %v362_v24, %v59_v21  ;;  %v65_v36 = vshrl.u32 %v363_v26, %v59_v21  ;;  %v68_v37 = vshrl.u32 %v364_v28, %v59_v21 }
  0x24   :  { %v71_v38 = vshrl.u32 %v365_v30, %v59_v21  ;;  %v74_v40 = vshrl.u32 %v366_v39, %v59_v21  ;;  %vm77_vm4 = vcmp.lt.s32.totalorder %v57_v20, 2  ;;  %vm78_vm5 = vcmp.lt.s32.totalorder %v57_v20, 3 }
  0x25   :  { %v63_v42 = vor.u32 %v62_v35, %v61_v23  ;;  %v66_v43 = vor.u32 %v65_v36, %v64_v25  ;;  %v69_v44 = vor.u32 %v68_v37, %v67_v27  ;;  %v163_v7 = vsub.s32 32, %v162_v57 }
  0x26   :  { %v72_v45 = vor.u32 %v71_v38, %v70_v29  ;;  %v75_v46 = vor.u32 %v74_v40, %v73_v31  ;;  %v165_v8 = vshll.u32 %v361_v22, %v162_v57  ;;  %v168_v9 = vshll.u32 %v362_v24, %v162_v57 }
  0x27   :  { %v80_v47 = vsel %vm76_vm2, %v60_v34, %v63_v42  ;;  %v81_v48 = vsel %vm79_vm3, %v69_v44, 2102212464  ;;  %v84_v49 = vsel %vm76_vm2, %v63_v42, %v66_v43  ;;  %v88_v50 = vsel %vm76_vm2, %v66_v43, %v69_v44 }
  0x28   :  { %v82_v51 = vsel %vm78_vm5, %v66_v43, %v81_v48  ;;  %v85_v52 = vsel %vm79_vm3, %v72_v45, 920167782  ;;  %v89_v53 = vsel %vm79_vm3, %v75_v46, 1326507024  ;;  %v171_v10 = vshll.u32 %v363_v26, %v162_v57 }
  0x29   :  { %v86_v54 = vsel %vm78_vm5, %v69_v44, %v85_v52  ;;  %v90_v55 = vsel %vm78_vm5, %v72_v45, %v89_v53  ;;  %v83_v58 = vsel %vm77_vm4, %v80_v47, %v82_v51  ;;  %v174_v13 = vshll.u32 %v364_v28, %v162_v57 }
  0x2a   :  { %v87_v59 = vsel %vm77_vm4, %v84_v49, %v86_v54  ;;  %v91_v60 = vsel %vm77_vm4, %v88_v50, %v90_v55  ;;  %v99_v11 = vmul.u32 %v421_v32, %v83_v58  ;;  %v177_v14 = vshll.u32 %v365_v30, %v162_v57 }
  0x2b   :  { %v425_v62 = vmul.u32.u64.low %v421_v32, %v91_v60  ;;  %v426_v63 = vmul.u32.u64.high %v421_v32, %v91_v60, %v425_v62  ;;  %v429_v0 = vmul.u32.u64.low %v421_v32, %v87_v59  ;;  %v430_v5 = vmul.u32.u64.high %v421_v32, %v87_v59, %v429_v0 }
  0x2c   :  { %vm180_vm6 = vcmp.lt.s32.totalorder %v161_v56, 1  ;;  %v164_v15 = vshrl.u32 %v361_v22, %v163_v7  ;;  %v166_v16 = vshrl.u32 %v362_v24, %v163_v7  ;;  %v169_v17 = vshrl.u32 %v363_v26, %v163_v7 }
  0x2d   :  { %v172_v18 = vshrl.u32 %v364_v28, %v163_v7  ;;  %vm101_vm7 = vc.u32 %v426_v63, %v429_v0  ;;  %v102_v19 = vadd.s32 1, %v430_v5  ;;  %v175_v20 = vshrl.u32 %v365_v30, %v163_v7 }
  0x2e   :  { %vm181_vm8 = vcmp.lt.s32.totalorder %v161_v56, 2  ;;  %v167_v21 = vor.u32 %v166_v16, %v165_v8  ;;  %v170_v23 = vor.u32 %v169_v17, %v168_v9  ;;  %v178_v27 = vshrl.u32 %v366_v39, %v163_v7 }
  0x2f   :  { %v173_v25 = vor.u32 %v172_v18, %v171_v10  ;;  %v103_v29 = vsel %vm101_vm7, %v102_v19, %v430_v5  ;;  %v176_v31 = vor.u32 %v175_v20, %v174_v13  ;;  %vm182_vm9 = vcmp.lt.s32.totalorder %v161_v56, 3 }
  0x30   :  { %vm183_vm10 = vcmp.lt.s32.totalorder %v161_v56, 4  ;;  %v104_v32 = vadd.s32 %v103_v29, %v99_v11  ;;  %v179_v22 = vor.u32 %v178_v27, %v177_v14  ;;  %v184_v24 = vsel %vm180_vm6, %v164_v15, %v167_v21 }
  0x31   :  { %v185_v26 = vsel %vm183_vm10, %v173_v25, 2102212464  ;;  %v188_v33 = vsel %vm180_vm6, %v167_v21, %v170_v23  ;;  %v189_v34 = vsel %vm183_vm10, %v176_v31, 920167782  ;;  %v192_v30 = vsel %vm180_vm6, %v170_v23, %v173_v25 }
  0x32   :  { %v186_v28 = vsel %vm182_vm9, %v170_v23, %v185_v26  ;;  %v105_v35 = vadd.s32 536870912, %v104_v32  ;;  %v190_v36 = vsel %vm182_vm9, %v173_v25, %v189_v34  ;;  %v193_v37 = vsel %vm183_vm10, %v179_v22, 1326507024 }
  0x33   :  { %v187_v38 = vsel %vm181_vm8, %v184_v24, %v186_v28  ;;  %v191_v39 = vsel %vm181_vm8, %v188_v33, %v190_v36  ;;  %v194_v40 = vsel %vm182_vm9, %v176_v31, %v193_v37  ;;  %v100_v60 = vadd.s32 %v429_v0, %v426_v63 }
  0x34   :  { %v106_v41 = vshrl.u32 %v105_v35, 30  ;;  %v195_v42 = vsel %vm181_vm8, %v192_v30, %v194_v40  ;;  %v442_v43 = vmul.u32.u64.low %v196_v61, %v191_v39  ;;  %v443_v44 = vmul.u32.u64.high %v196_v61, %v191_v39, %v442_v43 }
  0x35   :  { %v445_v45 = vmul.u32.u64.low %v196_v61, %v195_v42  ;;  %v446_v46 = vmul.u32.u64.high %v196_v61, %v195_v42, %v445_v45  ;;  %v203_v48 = vmul.u32 %v196_v61, %v187_v38  ;;  %v33_v0 = vmul.f32 0.5, %v403_v1 }
  0x36   :  { %v107_v47 = vshll.u32 %v106_v41, 30  ;;  %v206_v50 = vadd.s32 1, %v443_v44  ;;  %v130_v21 = vsub.s32 4, %v106_v41  ;;  %vm136_vm5 = vweird.f32 %v408_v3 }
  0x37   :  { %vm205_vm11 = vc.u32 %v446_v46, %v442_v43  ;;  %v204_v63 = vadd.s32 %v442_v43, %v446_v46  ;;  %300 = vtanh.f32 %v33_v0  ;;  %vm240_vm9 = vweird.f32 %v411_v4 }
  0x38   :  { %v108_v49 = vsub.s32 %v104_v32, %v107_v47  ;;  %v207_v52 = vsel %vm205_vm11, %v206_v50, %v443_v44  ;;  %v131_v22 = vsel %vm46_vm14, %v130_v21, %v106_v41  ;;  %v34_v41 = vmul.f32 0.5, %v405_v2 }
  0x39   :  { %v208_v53 = vadd.s32 %v207_v52, %v203_v48  ;;  %v133_v34 = vsel %vm45_vm15, 0, %v131_v22 }
  0x3a   :  { %v110_v51 = vsub.s32 0, %v108_v49  ;;  %v137_v38 = vadd.s32 3, %v133_v34 }
  0x3b   :  { %v209_v55 = vadd.s32 536870912, %v208_v53 }
  0x3c   :  { %v277_v54 = vmin.u32 %v110_v51, %v108_v49  ;;  %v138_v6 = vand.u32 3, %v137_v38 }
  0x3d   :  { %v210_v57 = vshrl.u32 %v209_v55, 30 }
  0x3e   :  { %v112_v56 = vclz %v277_v54  ;;  %vm143_vm2 = vcmp.eq.s32.totalorder %v138_v6, 2  ;;  %vm140_vm3 = vcmp.eq.s32.totalorder %v138_v6, 0  ;;  %vm139_vm4 = vcmp.lt.s32.totalorder %v138_v6, 2 }
  0x3f   :  { %v211_v59 = vshll.u32 %v210_v57, 30  ;;  %v234_v40 = vsub.s32 4, %v210_v57 }
  0x40   :  { %v278_v58 = vadd.s32 4294967294, %v112_v56 }
  0x41   :  { %v212_v61 = vsub.s32 %v208_v53, %v211_v59  ;;  %v235_v45 = vsel %vm150_vm0, %v234_v40, %v210_v57  ;;  %v301_v46 = vpop.eup %300  ;;  %v252_v57 = vstv %s490_s0  ;;  %s367_s0 = smov [#allocation7]  }
  0x42   :  { %vm279_vm12 = vcmp.lt.s32.totalorder %v278_v58, 0  ;;  %v237_v50 = vsel %vm462_vm1, 0, %v235_v45  ;;  %v37_v53 = vmul.f32 0.5, %v301_v46  ;;  %s267_s26 = sshll.u32 %s367_s0, 4  ;;  %s268_s26 = int_to_ptr.vmem [resolvable:$true] %s267_s26 }
  0x43   :  { %v115_v62 = vsel %vm279_vm12, 0, %v278_v58  ;;  %v214_v9 = vsub.s32 0, %v212_v61  ;;  %v241_v55 = vadd.s32 3, %v237_v50  ;;  %s334_s27 = scalar_lea.vmem %s268_s26, 256  ;;  %p339_p9 = scmp.lt.s32.totalorder %s268_s26, %s268_s26 }
  0x44   :  { %v116_v5 = vsub.s32 32, %v115_v62  ;;  %v117_v7 = vshll.u32 %v108_v49, %v115_v62  ;;  %v120_v8 = vsub.s32 4294967266, %v115_v62  ;;  %p335_p8 = scmp.ne.s32.totalorder %s268_s26, %s334_s27  ;;  %p340_p10 = scmp.lt.s32.totalorder %s334_s27, %s334_s27 }
  0x45   :  { %v281_v13 = vmin.u32 %v214_v9, %v212_v61 }
  0x46   :  { %v118_v10 = vshrl.u32 %v100_v60, %v116_v5  ;;  %v121_v11 = vadd.s32 127, %v120_v8  ;;  %v39_v60 = vadd.f32 0.5, %v37_v53  ;;  %p341_p11 = por %p340_p10, %p339_p9 }
  0x47   :  { %v216_v16 = vclz %v281_v13 }
  0x48   :  { %v119_v14 = vor.u32 %v118_v10, %v117_v7  ;;  %v122_v15 = vshll.u32 %v121_v11, 23  ;;  %p342_p12 = pnand %p341_p11, %p335_p8 }
  0x49   :  { %v282_v19 = vadd.s32 4294967294, %v216_v16 }
  0x4a   :  { %v123_v17 = vor.u32 4788187, %v122_v15  ;;  %v126_v18 = vcvt.s32.f32 %v119_v14 }
  0x4b   :  { %vm283_vm13 = vcmp.lt.s32.totalorder %v282_v19, 0 }
  0x4c   :  { %v124_v20 = vand.u32 2147483647, %v123_v17  ;;  %v219_v25 = vsel %vm283_vm13, 0, %v282_v19 }
  0x4d   :  { %v220_v27 = vsub.s32 32, %v219_v25  ;;  %v221_v29 = vshll.u32 %v212_v61, %v219_v25  ;;  %v224_v31 = vsub.s32 4294967266, %v219_v25  ;;  %v242_v61 = vand.u32 3, %v241_v55 }
  0x4e   :  { %v127_v23 = vmul.f32 %v126_v18, %v124_v20 }
  0x4f   :  { %v222_v24 = vshrl.u32 %v204_v63, %v220_v27  ;;  %v225_v26 = vadd.s32 127, %v224_v31  ;;  %vm247_vm6 = vcmp.eq.s32.totalorder %v242_v61, 2  ;;  %vm244_vm7 = vcmp.eq.s32.totalorder %v242_v61, 0 }
  0x50   :  { %v128_v32 = vxor.u32 2147483648, %v127_v23  ;;  %vm243_vm8 = vcmp.lt.s32.totalorder %v242_v61, 2 }
  0x51   :  { %v223_v30 = vor.u32 %v222_v24, %v221_v29  ;;  %v226_v35 = vshll.u32 %v225_v26, 23 }
  0x52   :  { %v129_v28 = vsel %vm46_vm14, %v128_v32, %v127_v23 }
  0x53   :  { %v132_v33 = vsel %vm45_vm15, %v408_v3, %v129_v28  ;;  %v227_v36 = vor.u32 4788187, %v226_v35  ;;  %v230_v37 = vcvt.s32.f32 %v223_v30 }
  0x54   :  { %302 = vcosq.f32 %v132_v33 }
  0x55   :  { %304 = vsinq.f32 %v132_v33  ;;  %v228_v39 = vand.u32 2147483647, %v227_v36 }
  0x56   :  { %306 = vtanh.f32 %v34_v41 }
  0x57   :  { %v231_v42 = vmul.f32 %v230_v37, %v228_v39 }
  0x59   :  { %v232_v44 = vxor.u32 2147483648, %v231_v42 }
  0x5b   :  { %v233_v47 = vsel %vm150_vm0, %v232_v44, %v231_v42 }
  0x5c   :  { %v236_v49 = vsel %vm462_vm1, %v411_v4, %v233_v47 }
  0x5d   :  { %308 = vcosq.f32 %v236_v49 }
  0x5e   :  { %v303_v48 = vpop.eup %302  ;;  %310 = vsinq.f32 %v236_v49 }
  0x5f   :  { %v305_v51 = vpop.eup %304  ;;  %v144_v12 = vxor.u32 2147483648, %v303_v48 }
  0x60   :  { %v141_v52 = vxor.u32 2147483648, %v305_v51  ;;  %v307_v7 = vpop.eup %306 }
  0x61   :  { %v145_v54 = vsel %vm143_vm2, %v144_v12, %v305_v51  ;;  %v38_v13 = vmul.f32 0.5, %v307_v7 }
  0x62   :  { %v142_v56 = vsel %vm140_vm3, %v303_v48, %v141_v52 }
  0x63   :  { %v146_v58 = vsel %vm139_vm4, %v142_v56, %v145_v54  ;;  %v40_v18 = vadd.f32 0.5, %v38_v13 }
  0x64   :  { %v147_v59 = vsel %vm136_vm5, nan, %v146_v58 }
  0x65   :  { %v253_v62 = vmul.f32 %v252_v57, %v147_v59 }
  0x67   :  { %v255_v5 = vadd.f32 %v253_v62, %v403_v1  ;;  %v309_v8 = vpop.eup %308 }
  0x68   :  { %v311_v10 = vpop.eup %310  ;;  %v248_v3 = vxor.u32 2147483648, %v309_v8 }
  0x69   :  { %v257_v9 = vmul.f32 %v255_v5, %v39_v60  ;;  %v245_v11 = vxor.u32 2147483648, %v311_v10 }
  0x6a   :  { %v249_v14 = vsel %vm247_vm6, %v248_v3, %v311_v10 }
  0x6b   :  { %259 = vst [vmem:[#allocation7] sm:$0xff] %v257_v9  ;;  %v246_v15 = vsel %vm244_vm7, %v309_v8, %v245_v11 }
  0x6c   :  { %v250_v16 = vsel %vm243_vm8, %v246_v15, %v249_v14 }
  0x6d   :  { %v251_v17 = vsel %vm240_vm9, nan, %v250_v16 }
  0x6e   :  { %v254_v19 = vmul.f32 %v252_v57, %v251_v17 }
  0x70   :  { %v256_v1 = vadd.f32 %v254_v19, %v405_v2 }
  0x72   :  { %v258_v20 = vmul.f32 %v256_v1, %v40_v18 }
  0x74   :  { %260 = vst [vmem:[#allocation7 + $0x8] sm:$0xff] %v258_v20 }
  0x75   :  { %345 = shalt.err (!%p342_p12)
}
  0x76   :  { %s346_s30 = scalar_lea.hbm %s493_s3, 256 }
  0x77   :  { %p347_p13 = scmp.ne.s32.totalorder %s493_s3, %s346_s30  ;;  %p350_p0 = scmp.lt.u32.totalorder %s346_s30, %s493_s3 }
  0x79   :  { %p352_p1 = pnand %p350_p0, %p347_p13 }
  0x7b   :  { %355 = shalt.err (!%p352_p1)
}
  0x7c   :  { %270 = dma.vmem_to_hbm [thread:$0]  %s268_s26, 256, %s493_s3, [#allocation6]  }
  0x7d   :  { %358 = dma.done.wait [#allocation6], 256  }
  0x7e   :  { %359 = vsyncadd [#allocation6], 4294967040 }
  0x7f   :  { %274 = vsyncpa [#allocation5], 1 }
  0x80   :  { %275 = vsyncpa [#allocation6], 1 }

</bundles_post_ra>
